<compile_context>
chip_gen: v6e
topology: v6e:2x2x1
jax: 0.10.0
libtpu: 0.0.40
codegen_flags: <defaults>
</compile_context>

<pallas_src>
import functools

import jax
import jax.numpy as jnp
from jax import lax
from jax.experimental import pallas as pl
from jax.experimental.pallas import tpu as pltpu

# BMSAELoss defaults (weights / thresholds; thresholds scaled by max(threshold)=80)
WEIGHTS = (1.0, 2.0, 5.0, 10.0, 30.0)
THRESHOLDS = tuple(t / 80.0 for t in (20.0, 30.0, 40.0, 50.0, 80.0))
MSE_W = 1.0
MAE_W = 1.0

LANES = 128
SUBLANES = 8
ROW_ALIGN = 16          # row multiple valid for both f32 (8) and bf16 (16) sublane tiling
CHUNK_ROWS = 512        # rows per inner chunk (256 KiB f32 temporaries per intermediate)
MAX_TILE_ROWS = 8192    # (8192,128) f32 tile == 4 MiB per input per pipeline buffer


def _round_up(x, m):
    return ((x + m - 1) // m) * m


def _choose_tile_rows(rows, max_tile_rows):
    """Largest row tile <= min(rows, max_tile_rows), multiple of ROW_ALIGN."""
    mtr = max(ROW_ALIGN, (int(max_tile_rows) // ROW_ALIGN) * ROW_ALIGN)
    tile = min(mtr, rows)
    tile = (tile // ROW_ALIGN) * ROW_ALIGN
    return max(tile, ROW_ALIGN)


def _make_bmsae_kernel(*, tile_rows, steps, n_splits, valid_rows_last, mask_needed):
    """Build the fused kernel for a fixed static tiling configuration."""
    n_full_chunks = tile_rows // CHUNK_ROWS
    rem_rows = tile_rows % CHUNK_ROWS  # multiple of ROW_ALIGN (possibly 0)

    def _chunk_partial(p_ref, t_ref, r0, nrows, masked):
        if not isinstance(r0, int):
            r0 = pl.multiple_of(r0, CHUNK_ROWS)
        p = p_ref[pl.ds(r0, nrows), :].astype(jnp.float32)
        t = t_ref[pl.ds(r0, nrows), :].astype(jnp.float32)

        # Sequential threshold re-assignment (exactly 5 cmp + 5 select per vreg),
        # mirroring the PyTorch loop: w_true[w_true < thresholds[i]] = weights[i].
        w = t
        for th, wt in zip(THRESHOLDS, WEIGHTS):
            w = jnp.where(w < jnp.float32(th), jnp.float32(wt), w)

        d = p - t
        sq = d * d
        ab = jnp.abs(d)
        # Skip the constant multiplies at trace time when the weights are 1.0.
        mse_term = sq if MSE_W == 1.0 else jnp.float32(MSE_W) * sq
        mae_term = ab if MAE_W == 1.0 else jnp.float32(MAE_W) * ab
        contrib = w * (mse_term + mae_term)

        if masked:
            # The last tile can extend past the array's row extent; those rows
            # hold garbage in VMEM and must be zeroed BEFORE accumulation.
            # (Lane-tail padding is genuine zeros, so rows suffice for masking.)
            row = lax.broadcasted_iota(jnp.int32, (nrows, LANES), 0) + r0
            contrib = jnp.where(row < valid_rows_last, contrib, 0.0)

        # (nrows,128) -> (8,128): pure VPU vreg adds, no cross-lane reduce.
        return jnp.sum(contrib.reshape(-1, SUBLANES, LANES), axis=0)

    def _tile_partial(p_ref, t_ref, masked):
        acc = jnp.zeros((SUBLANES, LANES), jnp.float32)
        if n_full_chunks == 1:
            acc = acc + _chunk_partial(p_ref, t_ref, 0, CHUNK_ROWS, masked)
        elif n_full_chunks > 1:
            acc = lax.fori_loop(
                0, n_full_chunks,
                lambda c, a: a + _chunk_partial(p_ref, t_ref, c * CHUNK_ROWS,
                                                CHUNK_ROWS, masked),
                acc)
        if rem_rows:
            acc = acc + _chunk_partial(p_ref, t_ref, n_full_chunks * CHUNK_ROWS,
                                       rem_rows, masked)
        return acc

    def kernel(p_ref, t_ref, out_ref, acc_ref):
        i = pl.program_id(1)

        @pl.when(i == 0)
        def _init():
            acc_ref[...] = jnp.zeros_like(acc_ref)

        if mask_needed:
            is_last_tile = jnp.logical_and(pl.program_id(0) == n_splits - 1,
                                           i == steps - 1)

            @pl.when(jnp.logical_not(is_last_tile))
            def _bulk():
                acc_ref[...] += _tile_partial(p_ref, t_ref, masked=False)

            @pl.when(is_last_tile)
            def _tail():
                acc_ref[...] += _tile_partial(p_ref, t_ref, masked=True)
        else:
            acc_ref[...] += _tile_partial(p_ref, t_ref, masked=False)

        @pl.when(i == steps - 1)
        def _finalize():
            out_ref[...] = acc_ref[...]

    return kernel


@functools.partial(jax.jit, static_argnames=("max_tile_rows",))
def bmsae_loss(y_pre, y_true, max_tile_rows=MAX_TILE_ROWS):
    """Pallas implementation of BMSAELoss(weights, thresholds, mse_w, mae_w).forward."""
    n_elems = y_pre.size  # static under jit

    p = y_pre.reshape(-1)
    t = y_true.reshape(-1)

    # Lane-dense (rows, 128) view.  Only the <128-element lane tail (and tiny
    # inputs rounded up to one (16,128) tile) get zero-padded; the row-tile
    # remainder of large inputs is masked in-kernel instead of padded+copied.
    # TODO(synk): the lane-tail pad still rewrites the inputs once for
    # n % 128 != 0; a 1-D-block kernel could remove that last copy too.
    padded = max(_round_up(n_elems, LANES), ROW_ALIGN * LANES)
    pad = padded - n_elems
    if pad:
        p = jnp.pad(p, (0, pad))
        t = jnp.pad(t, (0, pad))
    rows = padded // LANES
    p2 = p.reshape(rows, LANES)
    t2 = t.reshape(rows, LANES)

    tile_rows = _choose_tile_rows(rows, max_tile_rows)
    total_tiles = -(-rows // tile_rows)
    # Two disjoint output partials when the tile count allows it, so the outer
    # "parallel" axis can shard across both TensorCores on v7x (harmless on
    # single-core v5e/v6e).
    n_splits = 2 if (total_tiles >= 2 and total_tiles % 2 == 0) else 1
    steps = total_tiles // n_splits
    valid_rows_last = rows - (total_tiles - 1) * tile_rows
    mask_needed = valid_rows_last < tile_rows

    kernel = _make_bmsae_kernel(
        tile_rows=tile_rows, steps=steps, n_splits=n_splits,
        valid_rows_last=valid_rows_last, mask_needed=mask_needed)

    itemsize = jnp.dtype(y_pre.dtype).itemsize
    # 2 inputs x 2 pipeline buffers x tile + headroom for chunk temporaries.
    buf_bytes = 2 * 2 * tile_rows * LANES * itemsize
    vmem_limit = int(min(max(buf_bytes + (8 << 20), 32 << 20), 64 << 20))

    partials = pl.pallas_call(
        kernel,
        grid=(n_splits, steps),
        out_shape=jax.ShapeDtypeStruct((n_splits * SUBLANES, LANES), jnp.float32),
        in_specs=[
            pl.BlockSpec((tile_rows, LANES), lambda s, i: (s * steps + i, 0)),
            pl.BlockSpec((tile_rows, LANES), lambda s, i: (s * steps + i, 0)),
        ],
        out_specs=pl.BlockSpec((SUBLANES, LANES), lambda s, i: (s, 0)),
        scratch_shapes=[pltpu.VMEM((SUBLANES, LANES), jnp.float32)],
        compiler_params=pltpu.CompilerParams(
            dimension_semantics=("parallel", "arbitrary"),
            vmem_limit_bytes=vmem_limit),
    )(p2, t2)

    # Tiny (<= 2 KiB) final reduction + compile-time 1/N scale (shared by the
    # MSE and MAE means).
    return jnp.sum(partials) * jnp.float32(1.0 / n_elems)


def _reference_bmsae(y_pre, y_true):
    """Pure-JAX reference of the PyTorch BMSAELoss.forward, for validation."""
    w = y_true.astype(jnp.float32)
    for th, wt in zip(THRESHOLDS, WEIGHTS):
        w = jnp.where(w < th, wt, w)
    d = y_pre.astype(jnp.float32) - y_true.astype(jnp.float32)
    return MSE_W * jnp.mean(w * d * d) + MAE_W * jnp.mean(w * jnp.abs(d))


def _check(name, y_pre, y_true, **kw):
    got = jax.block_until_ready(bmsae_loss(y_pre, y_true, **kw))
    ref = jax.block_until_ready(_reference_bmsae(y_pre, y_true))
    assert jnp.allclose(got, ref, rtol=1e-5, atol=1e-6), (name, got, ref)


if __name__ == "__main__":
    key = jax.random.PRNGKey(0)
    ks = jax.random.split(key, 8)

    # NCHW radar frames: batch=2, channels=4, spatial=16x16.
    y_pre = jax.random.uniform(ks[0], (2, 4, 16, 16), dtype=jnp.float32)
    y_true = jax.random.uniform(ks[1], (2, 4, 16, 16), dtype=jnp.float32)
    # TODO(synk): the module's runtime asserts on y_true in [0, 1] are host-side
    # here, not in-kernel.
    assert float(y_true.min()) >= 0.0 and float(y_true.max()) <= 1.0
    _check("base", y_pre, y_true)

    # Ragged element count (n % 128 != 0): tiny zero pad + single small tile.
    _check("ragged",
           jax.random.uniform(ks[2], (2, 3, 17, 13), dtype=jnp.float32),
           jax.random.uniform(ks[3], (2, 3, 17, 13), dtype=jnp.float32))

    # Multi-tile grid with the 2-way "parallel" split (small tile override).
    _check("multi_tile",
           jax.random.uniform(ks[4], (2, 4, 64, 128), dtype=jnp.float32),
           jax.random.uniform(ks[5], (2, 4, 64, 128), dtype=jnp.float32),
           max_tile_rows=64)

    # Chunked fori_loop body (2 full chunks + 16-row remainder) in one big tile.
    y_pre4 = jax.random.uniform(ks[6], (2, 8, 65, 128), dtype=jnp.float32)
    y_true4 = jax.random.uniform(ks[7], (2, 8, 65, 128), dtype=jnp.float32)
    _check("chunked", y_pre4, y_true4)

    # Multi-tile + in-kernel masking of the partial last tile (tile override).
    _check("masked_tail", y_pre4, y_true4, max_tile_rows=512)

    print("KERNEL_OK")
</pallas_src>

<mosaic_0001>
module attributes {stable_mosaic.version = 11 : i64} {
  func.func @kernel(%arg0: i32, %arg1: i32, %arg2: memref<16x128xf32, #tpu.memory_space<vmem>>, %arg3: memref<16x128xf32, #tpu.memory_space<vmem>>, %arg4: memref<8x128xf32, #tpu.memory_space<vmem>>, %arg5: memref<8x128xf32, #tpu.memory_space<vmem>>) attributes {dimension_semantics = [#tpu.dimension_semantics<parallel>, #tpu.dimension_semantics<arbitrary>], iteration_bounds = array<i64: 1, 1>, scalar_prefetch = 0 : i64, scratch_operands = 1 : i64, tpu.core_type = #tpu.core_type<tc>, window_params = [{transform_indices = @transform_0, window_bounds = array<i64: 16, 128>}, {transform_indices = @transform_1, window_bounds = array<i64: 16, 128>}, {transform_indices = @transform_2, window_bounds = array<i64: 8, 128>}]} {
    %c0_i32 = arith.constant 0 : i32
    %0 = arith.cmpi eq, %arg1, %c0_i32 : i32
    %1 = arith.extui %0 : i1 to i32
    %c0_i32_0 = arith.constant 0 : i32
    %2 = arith.cmpi ne, %1, %c0_i32_0 : i32
    scf.if %2 {
      %cst_21 = arith.constant 0.000000e+00 : f32
      %40 = vector.broadcast %cst_21 : f32 to vector<8x128xf32>
      %c0_22 = arith.constant 0 : index
      %c0_23 = arith.constant 0 : index
      %41 = vector.load %arg5[%c0_22, %c0_23] : memref<8x128xf32, #tpu.memory_space<vmem>>, vector<8x128xf32>
      tpu.vector_store %arg5[%c0_22, %c0_23], %40 {strides = array<i32>} : memref<8x128xf32, #tpu.memory_space<vmem>>, vector<8x128xf32>,
    } else {
    }
    %c0 = arith.constant 0 : index
    %c0_1 = arith.constant 0 : index
    %3 = vector.load %arg5[%c0, %c0_1] : memref<8x128xf32, #tpu.memory_space<vmem>>, vector<8x128xf32>
    %cst = arith.constant 0.000000e+00 : f32
    %4 = vector.broadcast %cst : f32 to vector<8x128xf32>
    %c0_2 = arith.constant 0 : index
    %c0_3 = arith.constant 0 : index
    %5 = vector.load %arg2[%c0_2, %c0_3] : memref<16x128xf32, #tpu.memory_space<vmem>>, vector<16x128xf32>
    %c0_4 = arith.constant 0 : index
    %c0_5 = arith.constant 0 : index
    %6 = vector.load %arg3[%c0_4, %c0_5] : memref<16x128xf32, #tpu.memory_space<vmem>>, vector<16x128xf32>
    %cst_6 = arith.constant 2.500000e-01 : f32
    %7 = vector.broadcast %cst_6 : f32 to vector<16x128xf32>
    %8 = arith.cmpf olt, %6, %7 : vector<16x128xf32>
    %cst_7 = arith.constant 1.000000e+00 : f32
    %9 = vector.broadcast %cst_7 : f32 to vector<16x128xf32>
    %10 = arith.select %8, %9, %6 : vector<16x128xi1>, vector<16x128xf32>
    %cst_8 = arith.constant 3.750000e-01 : f32
    %11 = vector.broadcast %cst_8 : f32 to vector<16x128xf32>
    %12 = arith.cmpf olt, %10, %11 : vector<16x128xf32>
    %cst_9 = arith.constant 2.000000e+00 : f32
    %13 = vector.broadcast %cst_9 : f32 to vector<16x128xf32>
    %14 = arith.select %12, %13, %10 : vector<16x128xi1>, vector<16x128xf32>
    %cst_10 = arith.constant 5.000000e-01 : f32
    %15 = vector.broadcast %cst_10 : f32 to vector<16x128xf32>
    %16 = arith.cmpf olt, %14, %15 : vector<16x128xf32>
    %cst_11 = arith.constant 5.000000e+00 : f32
    %17 = vector.broadcast %cst_11 : f32 to vector<16x128xf32>
    %18 = arith.select %16, %17, %14 : vector<16x128xi1>, vector<16x128xf32>
    %cst_12 = arith.constant 6.250000e-01 : f32
    %19 = vector.broadcast %cst_12 : f32 to vector<16x128xf32>
    %20 = arith.cmpf olt, %18, %19 : vector<16x128xf32>
    %cst_13 = arith.constant 1.000000e+01 : f32
    %21 = vector.broadcast %cst_13 : f32 to vector<16x128xf32>
    %22 = arith.select %20, %21, %18 : vector<16x128xi1>, vector<16x128xf32>
    %cst_14 = arith.constant 1.000000e+00 : f32
    %23 = vector.broadcast %cst_14 : f32 to vector<16x128xf32>
    %24 = arith.cmpf olt, %22, %23 : vector<16x128xf32>
    %cst_15 = arith.constant 3.000000e+01 : f32
    %25 = vector.broadcast %cst_15 : f32 to vector<16x128xf32>
    %26 = arith.select %24, %25, %22 : vector<16x128xi1>, vector<16x128xf32>
    %27 = arith.subf %5, %6 : vector<16x128xf32>
    %28 = arith.mulf %27, %27 : vector<16x128xf32>
    %29 = math.absf %27 : vector<16x128xf32>
    %30 = arith.addf %28, %29 : vector<16x128xf32>
    %31 = arith.mulf %26, %30 : vector<16x128xf32>
    %32 = vector.shape_cast %31 : vector<16x128xf32> to vector<2x8x128xf32>
    %cst_16 = arith.constant dense<0.000000e+00> : vector<8x128xf32>
    %33 = vector.multi_reduction <add>, %32, %cst_16 [0] : vector<2x8x128xf32> to vector<8x128xf32>
    %34 = arith.addf %4, %33 : vector<8x128xf32>
    %35 = arith.addf %3, %34 : vector<8x128xf32>
    %c0_17 = arith.constant 0 : index
    %c0_18 = arith.constant 0 : index
    %36 = vector.load %arg5[%c0_17, %c0_18] : memref<8x128xf32, #tpu.memory_space<vmem>>, vector<8x128xf32>
    tpu.vector_store %arg5[%c0_17, %c0_18], %35 {strides = array<i32>} : memref<8x128xf32, #tpu.memory_space<vmem>>, vector<8x128xf32>,
    %c0_i32_19 = arith.constant 0 : i32
    %37 = arith.cmpi eq, %arg1, %c0_i32_19 : i32
    %38 = arith.extui %37 : i1 to i32
    %c0_i32_20 = arith.constant 0 : i32
    %39 = arith.cmpi ne, %38, %c0_i32_20 : i32
    scf.if %39 {
      %c0_21 = arith.constant 0 : index
      %c0_22 = arith.constant 0 : index
      %40 = vector.load %arg5[%c0_21, %c0_22] : memref<8x128xf32, #tpu.memory_space<vmem>>, vector<8x128xf32>
      %c0_23 = arith.constant 0 : index
      %c0_24 = arith.constant 0 : index
      %41 = vector.load %arg4[%c0_23, %c0_24] : memref<8x128xf32, #tpu.memory_space<vmem>>, vector<8x128xf32>
      tpu.vector_store %arg4[%c0_23, %c0_24], %40 {strides = array<i32>} : memref<8x128xf32, #tpu.memory_space<vmem>>, vector<8x128xf32>,
    } else {
    }
    return
  }
  func.func @transform_0(%arg0: i32, %arg1: i32) -> (i32, i32) {
    %c1_i32 = arith.constant 1 : i32
    %0 = arith.muli %arg0, %c1_i32 : i32
    %1 = arith.addi %0, %arg1 : i32
    %c0_i32 = arith.constant 0 : i32
    %c0_i32_0 = arith.constant 0 : i32
    return %1, %c0_i32 : i32, i32
  }
  func.func @transform_1(%arg0: i32, %arg1: i32) -> (i32, i32) {
    %c1_i32 = arith.constant 1 : i32
    %0 = arith.muli %arg0, %c1_i32 : i32
    %1 = arith.addi %0, %arg1 : i32
    %c0_i32 = arith.constant 0 : i32
    %c0_i32_0 = arith.constant 0 : i32
    return %1, %c0_i32 : i32, i32
  }
  func.func @transform_2(%arg0: i32, %arg1: i32) -> (i32, i32) {
    %c0_i32 = arith.constant 0 : i32
    %c0_i32_0 = arith.constant 0 : i32
    return %arg0, %c0_i32 : i32, i32
  }
}

</mosaic_0001>

<bundles_post_ra>
// kernel: bmsae_loss.1
= control target key start
LH: loop header
LB: loop body
LE: loop exit
PB: predicated region body
PF: predicated region fallthrough
CT: control target
= control target key end

     0   :  { %s150_s0 = inlined_call_operand.vmem [shape: f32[16,128], index: 0, kind: input, shape index: {}]   ;;  %s151_s1 = inlined_call_operand.vmem [shape: f32[16,128], index: 1, kind: input, shape index: {}]   ;;  %s152_s2 = inlined_call_operand.vmem [shape: f32[8,128], index: 2, kind: output, shape index: {}]  }
   0x1   :  { %v61_v0 = vld [vmem:[%s150_s0] sm:$0xff]  ;;  %v62_v1 = vld [vmem:[%s150_s0 + $0x8] sm:$0xff] }
   0x2   :  { %v63_v2 = vld [vmem:[%s151_s1] sm:$0xff]  ;;  %v64_v3 = vld [vmem:[%s151_s1 + $0x8] sm:$0xff] }
   0x3   :  { %vm65_vm0 = vcmp.lt.f32.partialorder %v63_v2, 0.25  ;;  %v85_v4 = vsub.f32 %v61_v0, %v63_v2  ;;  %vm66_vm1 = vcmp.lt.f32.partialorder %v64_v3, 0.25  ;;  %v86_v6 = vsub.f32 %v62_v1, %v64_v3 }
   0x4   :  { %v67_v5 = vsel %vm65_vm0, 1.0, %v63_v2  ;;  %v68_v7 = vsel %vm66_vm1, 1.0, %v64_v3 }
   0x5   :  { %vm69_vm2 = vcmp.lt.f32.partialorder %v67_v5, 0.375  ;;  %v87_v8 = vmul.f32 %v85_v4, %v85_v4  ;;  %v89_v9 = vand.u32 2147483647, %v85_v4  ;;  %vm70_vm3 = vcmp.lt.f32.partialorder %v68_v7, 0.375 }
   0x6   :  { %v71_v10 = vsel %vm69_vm2, 2.0, %v67_v5  ;;  %v88_v11 = vmul.f32 %v86_v6, %v86_v6  ;;  %v90_v12 = vand.u32 2147483647, %v86_v6  ;;  %v72_v13 = vsel %vm70_vm3, 2.0, %v68_v7 }
   0x7   :  { %vm73_vm4 = vcmp.lt.f32.partialorder %v71_v10, 0.5  ;;  %vm74_vm5 = vcmp.lt.f32.partialorder %v72_v13, 0.5  ;;  %v91_v16 = vadd.f32 %v89_v9, %v87_v8 }
   0x8   :  { %v75_v14 = vsel %vm73_vm4, 5.0, %v71_v10  ;;  %v76_v15 = vsel %vm74_vm5, 5.0, %v72_v13  ;;  %v92_v18 = vadd.f32 %v90_v12, %v88_v11 }
   0x9   :  { %vm77_vm6 = vcmp.lt.f32.partialorder %v75_v14, 0.625  ;;  %vm78_vm7 = vcmp.lt.f32.partialorder %v76_v15, 0.625 }
   0xa   :  { %v79_v17 = vsel %vm77_vm6, 10.0, %v75_v14  ;;  %v80_v19 = vsel %vm78_vm7, 10.0, %v76_v15 }
   0xb   :  { %vm81_vm8 = vcmp.lt.f32.partialorder %v79_v17, 1.0  ;;  %vm82_vm9 = vcmp.lt.f32.partialorder %v80_v19, 1.0 }
   0xc   :  { %v83_v20 = vsel %vm81_vm8, 30.0, %v79_v17  ;;  %v84_v21 = vsel %vm82_vm9, 30.0, %v80_v19 }
   0xd   :  { %v93_v22 = vmul.f32 %v91_v16, %v83_v20  ;;  %v94_v23 = vmul.f32 %v92_v18, %v84_v21 }
   0xf   :  { %v95_v24 = vadd.f32 %v94_v23, %v93_v22 }
  0x11   :  { %103 = vst [vmem:[%s152_s2] sm:$0xff] %v95_v24 }

</bundles_post_ra>
